<compile_context>
chip_gen: v7x
topology: tpu7x:2x2x1
jax: 0.10.0
libtpu: 0.0.40
codegen_flags: <defaults>
</compile_context>

<pallas_src>
import functools

import jax
import jax.numpy as jnp
from jax import lax
from jax.experimental import pallas as pl
from jax.experimental.pallas import tpu as pltpu

# Large finite negative instead of -inf: masked logits underflow to 0 after exp,
# and fully-masked rows degrade gracefully instead of producing NaN.
_MASK_VALUE = -1e30

_Q_TILE_PREFS = (256, 128, 64, 32, 16, 8)
_K_TILE_PREFS = (512, 256, 128)


def _sdpa_kernel(*refs, scale, block_k, num_k_blocks, has_mask, kv_resident):
    if has_mask:
        (q_ref, k_ref, v_ref, mask_ref,
         ctx_ref, attn_ref, m_sc, l_sc, acc_sc, mtile_sc) = refs
    else:
        (q_ref, k_ref, v_ref,
         ctx_ref, attn_ref, m_sc, l_sc, acc_sc, mtile_sc) = refs
        mask_ref = None

    ki = pl.program_id(2)

    @pl.when(ki == 0)
    def _init():
        m_sc[...] = jnp.full(m_sc.shape, _MASK_VALUE, jnp.float32)
        l_sc[...] = jnp.zeros(l_sc.shape, jnp.float32)
        acc_sc[...] = jnp.zeros(acc_sc.shape, jnp.float32)

    q = q_ref[0]                                       # (tq, D)  native dtype -> MXU-native
    if scale:                                          # matches `if scale:` in the module
        q = q * jnp.asarray(scale, dtype=q.dtype)      # fold scale into q: O(tq*D) work

    if kv_resident and num_k_blocks > 1:
        # K/V are resident in VMEM for the whole batch element; slice this k-tile.
        row = pl.multiple_of(ki * block_k, 128)
        k = k_ref[0, pl.ds(row, block_k), :]           # (tk, D)
        v = v_ref[0, pl.ds(row, block_k), :]           # (tk, Dv)
    else:
        k = k_ref[0]                                   # (tk, D)
        v = v_ref[0]                                   # (tk, Dv)

    # scores = q @ k^T, contracting D directly (no transposed copy of K), f32 accumulation.
    s = lax.dot_general(q, k, (((1,), (1,)), ((), ())),
                        preferred_element_type=jnp.float32)          # (tq, tk) f32

    if has_mask:
        s = jnp.where(mask_ref[0] != 0, jnp.float32(_MASK_VALUE), s)

    # --- online softmax update (flash-style) ---
    m_prev = m_sc[...]                                               # (tq, 1)
    m_new = jnp.maximum(m_prev, jnp.max(s, axis=-1, keepdims=True))
    alpha = jnp.exp(m_prev - m_new)
    p = jnp.exp(s - m_new)                                           # (tq, tk) in (0, 1]
    l_sc[...] = alpha * l_sc[...] + jnp.sum(p, axis=-1, keepdims=True)
    acc_sc[...] = alpha * acc_sc[...] + jnp.dot(
        p.astype(v.dtype), v, preferred_element_type=jnp.float32)
    m_sc[...] = m_new

    if num_k_blocks > 1:
        # Stash p (well conditioned even in bf16, unlike raw logits) plus the running max
        # used for it; the finalize then only needs a per-block rescale — no 2nd exp pass.
        @pl.when(ki < num_k_blocks - 1)
        def _stash():
            col = pl.multiple_of(ki * block_k, 128)
            attn_ref[0, :, pl.ds(col, block_k)] = p.astype(attn_ref.dtype)
            mtile_sc[ki] = m_new

    @pl.when(ki == num_k_blocks - 1)
    def _finalize():
        inv_l = pl.reciprocal(l_sc[...], approx=True)                # EUP slot
        if num_k_blocks > 1:
            m_fin = m_sc[...]
            for j in range(num_k_blocks - 1):                        # static unroll (nk small)
                corr = jnp.exp(mtile_sc[j] - m_fin) * inv_l          # (tq, 1)
                lo = j * block_k
                blk = attn_ref[0, :, lo:lo + block_k].astype(jnp.float32)
                attn_ref[0, :, lo:lo + block_k] = (blk * corr).astype(attn_ref.dtype)
            lo = (num_k_blocks - 1) * block_k
            attn_ref[0, :, lo:lo + block_k] = (p * inv_l).astype(attn_ref.dtype)
        else:
            attn_ref[0] = (p * inv_l).astype(attn_ref.dtype)
        ctx_ref[0] = (acc_sc[...] * inv_l).astype(ctx_ref.dtype)

    # TODO(synk): nn.Dropout(attention_dropout=0.0) is the identity; a nonzero-rate
    # train-mode dropout would use pltpu.prng_seed / pltpu.prng_random_bits here.


def _ceil_to(n, m):
    return ((n + m - 1) // m) * m


def _buf_bytes(rows, cols, itemsize):
    # VMEM buffers are padded to (8, 128) (sublane, lane) tiles.
    return _ceil_to(rows, 8) * _ceil_to(cols, 128) * itemsize


def _vmem_budget_bytes():
    cap = 64 * 1024 * 1024                     # conservative default (v7x: 64 MiB / core)
    try:
        cap = int(pltpu.get_tpu_info().vmem_capacity_bytes)   # generation aware
    except Exception:
        pass
    # 75% of physical VMEM, capped at 100 MiB (v5e/v6e 128 MiB -> ~96 MiB budget,
    # v7x 64 MiB -> 48 MiB budget).
    return max(min(cap * 3 // 4, 100 * 1024 * 1024), 24 * 1024 * 1024)


def _tile_candidates(total, prefs, align):
    cands = []
    if total <= prefs[0]:
        cands.append(total)                    # whole axis in a single tile
    for t in prefs:
        if t < total and total % t == 0 and t % align == 0 and t not in cands:
            cands.append(t)
    if not cands:
        # TODO(synk): pad/mask ragged axes instead of falling back to one big tile.
        cands.append(total)
    return cands


def scaled_dot_product_attention(q, k, v, scale=None, attn_mask=None, *,
                                 block_q=None, block_k=None, kv_resident=None,
                                 attention_dtype=None):
    """Pallas implementation of ScaledDotProductAttention.forward -> (context, attention)."""
    B, Lq, D = q.shape
    Bk, Lk, Dk = k.shape
    Bv, Lv, Dv = v.shape
    assert Bk == B and Bv == B and Dk == D and Lv == Lk

    attn_dtype = jnp.dtype(attention_dtype) if attention_dtype is not None else q.dtype
    has_mask = attn_mask is not None
    if has_mask:
        assert attn_mask.shape == (B, Lq, Lk)
        if attn_mask.dtype.itemsize != 1:          # bool/int8/uint8 ship as-is (no HBM pass)
            attn_mask = attn_mask.astype(jnp.int8)

    budget = _vmem_budget_bytes()
    q_isz, k_isz, v_isz = q.dtype.itemsize, k.dtype.itemsize, v.dtype.itemsize

    def _fits(tq, tk, kv_res):
        nk = max(1, Lk // tk)
        need = 2 * _buf_bytes(tq, D, q_isz)                        # q tile (double buffered)
        if kv_res:                                                 # K/V resident per batch
            need += 2 * (_buf_bytes(Lk, D, k_isz) + _buf_bytes(Lk, Dv, v_isz))
        else:                                                      # K/V streamed per k-tile
            need += 2 * (_buf_bytes(tk, D, k_isz) + _buf_bytes(tk, Dv, v_isz))
        if has_mask:
            need += 2 * _buf_bytes(tq, tk, 1)
        need += 2 * _buf_bytes(tq, Lk, attn_dtype.itemsize)        # attention out tile
        need += 2 * _buf_bytes(tq, Dv, q_isz)                      # context out tile
        need += _buf_bytes(tq, Dv, 4) + 2 * _buf_bytes(tq, 1, 4)   # acc + m + l scratch
        need += max(nk - 1, 1) * _buf_bytes(tq, 1, 4)              # per-k-tile max scratch
        return need <= budget

    tq_cands = ([min(block_q, Lq)] if block_q is not None
                else _tile_candidates(Lq, _Q_TILE_PREFS, 8))
    tk_cands = ([min(block_k, Lk)] if block_k is not None
                else _tile_candidates(Lk, _K_TILE_PREFS, 128))
    # TODO(synk): prefer tq=128 on v5e (128-wide MXU) once TpuInfo reliably exposes MXU dims.
    kv_options = (True, False) if kv_resident is None else (bool(kv_resident),)

    chosen = None
    for kv_res in kv_options:                  # prefer resident K/V (kills re-streaming)
        for tq in tq_cands:                    # then the largest tiles that fit the budget
            for tk in tk_cands:
                if _fits(tq, tk, kv_res):
                    chosen = (tq, tk, kv_res)
                    break
            if chosen:
                break
        if chosen:
            break
    if chosen is None:
        chosen = (tq_cands[-1], tk_cands[-1],
                  False if kv_resident is None else bool(kv_resident))
    tq, tk, kv_res = chosen

    assert Lq % tq == 0 and Lk % tk == 0, "ragged Lq/Lk vs tile size (TODO: pad/mask)"
    nq, nk = Lq // tq, Lk // tk
    if nk > 1:
        assert tk % 128 == 0, "k-tile must be a multiple of 128 when Lk is tiled"

    inputs = [q, k, v]
    in_specs = [pl.BlockSpec((1, tq, D), lambda b, qi, ki: (b, qi, 0))]
    if kv_res:
        in_specs += [pl.BlockSpec((1, Lk, D), lambda b, qi, ki: (b, 0, 0)),
                     pl.BlockSpec((1, Lk, Dv), lambda b, qi, ki: (b, 0, 0))]
    else:
        in_specs += [pl.BlockSpec((1, tk, D), lambda b, qi, ki: (b, ki, 0)),
                     pl.BlockSpec((1, tk, Dv), lambda b, qi, ki: (b, ki, 0))]
    if has_mask:
        inputs.append(attn_mask)
        in_specs.append(pl.BlockSpec((1, tq, tk), lambda b, qi, ki: (b, qi, ki)))

    kernel = functools.partial(_sdpa_kernel, scale=scale, block_k=tk,
                               num_k_blocks=nk, has_mask=has_mask, kv_resident=kv_res)

    grid_spec = pltpu.PrefetchScalarGridSpec(
        num_scalar_prefetch=0,
        grid=(B, nq, nk),
        in_specs=in_specs,
        out_specs=[
            pl.BlockSpec((1, tq, Dv), lambda b, qi, ki: (b, qi, 0)),  # context (resident over ki)
            pl.BlockSpec((1, tq, Lk), lambda b, qi, ki: (b, qi, 0)),  # attention row (lane dense)
        ],
        scratch_shapes=[
            pltpu.VMEM((tq, 1), jnp.float32),                  # running max
            pltpu.VMEM((tq, 1), jnp.float32),                  # running sum
            pltpu.VMEM((tq, Dv), jnp.float32),                 # context accumulator
            pltpu.VMEM((max(nk - 1, 1), tq, 1), jnp.float32),  # per-k-tile max (rescale)
        ],
    )

    context, attention = pl.pallas_call(
        kernel,
        out_shape=(
            jax.ShapeDtypeStruct((B, Lq, Dv), q.dtype),
            jax.ShapeDtypeStruct((B, Lq, Lk), attn_dtype),
        ),
        grid_spec=grid_spec,
        compiler_params=pltpu.CompilerParams(
            # ki carries the online-softmax accumulator -> "arbitrary"; B and the q-tile
            # axes are independent -> "parallel" (keep B*nq >= 2 so v7x's two TCs stay busy).
            dimension_semantics=("parallel", "parallel", "arbitrary"),
            vmem_limit_bytes=int(budget),
        ),
    )(*inputs)
    return context, attention


def _reference(q, k, v, scale=None, attn_mask=None):
    hp = lax.Precision.HIGHEST
    scores = jnp.einsum("bqd,bkd->bqk", q, k, precision=hp)
    if scale:
        scores = scores * scale
    if attn_mask is not None:
        scores = jnp.where(attn_mask, -jnp.inf, scores)
    attn = jax.nn.softmax(scores, axis=2)
    ctx = jnp.einsum("bqk,bkd->bqd", attn, v, precision=hp)
    return ctx, attn


def _check(key, *, B, Lq, Lk, D, Dv, scale, use_mask, input_scale=1.0, **kwargs):
    kq, kk, kv, km = jax.random.split(key, 4)
    q = jax.random.normal(kq, (B, Lq, D), dtype=jnp.float32) * input_scale
    k = jax.random.normal(kk, (B, Lk, D), dtype=jnp.float32) * input_scale
    v = jax.random.normal(kv, (B, Lk, Dv), dtype=jnp.float32)
    if use_mask:
        mask = jax.random.bernoulli(km, 0.25, (B, Lq, Lk))
        mask = mask.at[:, :, 0].set(False)     # keep >=1 unmasked key per query
    else:
        mask = None

    ctx, attn = scaled_dot_product_attention(q, k, v, scale=scale, attn_mask=mask,
                                             **kwargs)
    jax.block_until_ready((ctx, attn))
    assert ctx.shape == (B, Lq, Dv) and attn.shape == (B, Lq, Lk)

    ctx_exp, attn_exp = _reference(q, k, v, scale=scale, attn_mask=mask)
    # Tolerance covers DEFAULT-precision (bf16-pass) f32 matmuls on either execution
    # path plus the approximate (EUP) reciprocal used for the softmax normalization.
    assert jnp.allclose(ctx, ctx_exp, atol=2e-2, rtol=2e-2), "context mismatch"
    assert jnp.allclose(attn, attn_exp, atol=2e-2, rtol=2e-2), "attention mismatch"


if __name__ == "__main__":
    key = jax.random.PRNGKey(0)
    k1, k2, k3, k4 = jax.random.split(key, 4)

    # 1) Small single-tile case matching the module's toy usage (B=2, L=8, D=32).
    _check(k1, B=2, Lq=8, Lk=8, D=32, Dv=32, scale=1.0 / (32 ** 0.5), use_mask=True)

    # 2) Tiled online-softmax path (nq=2, nk=2): resident K/V + per-tile rescale finalize.
    _check(k2, B=2, Lq=256, Lk=256, D=64, Dv=128, scale=1.0 / (64 ** 0.5),
           use_mask=True, block_q=128, block_k=128, kv_resident=True)

    # 3) Same shapes, streamed (non-resident) K/V path.
    _check(k3, B=2, Lq=256, Lk=256, D=64, Dv=128, scale=1.0 / (64 ** 0.5),
           use_mask=True, block_q=128, block_k=128, kv_resident=False)

    # 4) No-mask / no-scale branch with derived (large) tiles; inputs scaled down so the
    #    unscaled logits stay moderate.
    _check(k4, B=2, Lq=256, Lk=256, D=32, Dv=64, scale=None, use_mask=False,
           input_scale=0.35)

    print("KERNEL_OK")
</pallas_src>

<mosaic_0001>
module attributes {stable_mosaic.version = 11 : i64} {
  func.func @_sdpa_kernel(%arg0: i32, %arg1: i32, %arg2: i32, %arg3: memref<1x8x32xf32, #tpu.memory_space<vmem>>, %arg4: memref<1x8x32xf32, #tpu.memory_space<vmem>>, %arg5: memref<1x8x32xf32, #tpu.memory_space<vmem>>, %arg6: memref<1x8x8xi32, #tpu.memory_space<vmem>>, %arg7: memref<1x8x32xf32, #tpu.memory_space<vmem>>, %arg8: memref<1x8x8xf32, #tpu.memory_space<vmem>>, %arg9: memref<8x1xf32, #tpu.memory_space<vmem>>, %arg10: memref<8x1xf32, #tpu.memory_space<vmem>>, %arg11: memref<8x32xf32, #tpu.memory_space<vmem>>, %arg12: memref<1x8x1xf32, #tpu.memory_space<vmem>>) attributes {dimension_semantics = [#tpu.dimension_semantics<parallel>, #tpu.dimension_semantics<parallel>, #tpu.dimension_semantics<arbitrary>], iteration_bounds = array<i64: 2, 1, 1>, scalar_prefetch = 0 : i64, scratch_operands = 4 : i64, tpu.core_type = #tpu.core_type<tc>, window_params = [{transform_indices = @transform_0, window_bounds = array<i64: 1, 8, 32>}, {transform_indices = @transform_1, window_bounds = array<i64: 1, 8, 32>}, {transform_indices = @transform_2, window_bounds = array<i64: 1, 8, 32>}, {transform_indices = @transform_3, window_bounds = array<i64: 1, 8, 8>}, {transform_indices = @transform_4, window_bounds = array<i64: 1, 8, 32>}, {transform_indices = @transform_5, window_bounds = array<i64: 1, 8, 8>}]} {
    %c0_i32 = arith.constant 0 : i32
    %0 = arith.cmpi eq, %arg2, %c0_i32 : i32
    %1 = arith.extui %0 : i1 to i32
    %c0_i32_0 = arith.constant 0 : i32
    %2 = arith.cmpi ne, %1, %c0_i32_0 : i32
    scf.if %2 {
      %cst_33 = arith.constant -1.000000e+30 : f32
      %45 = vector.broadcast %cst_33 : f32 to vector<8x1xf32>
      %c0_34 = arith.constant 0 : index
      %c0_35 = arith.constant 0 : index
      %46 = vector.load %arg9[%c0_34, %c0_35] : memref<8x1xf32, #tpu.memory_space<vmem>>, vector<8x1xf32>
      tpu.vector_store %arg9[%c0_34, %c0_35], %45 {strides = array<i32>} : memref<8x1xf32, #tpu.memory_space<vmem>>, vector<8x1xf32>,
      %cst_36 = arith.constant 0.000000e+00 : f32
      %47 = vector.broadcast %cst_36 : f32 to vector<8x1xf32>
      %c0_37 = arith.constant 0 : index
      %c0_38 = arith.constant 0 : index
      %48 = vector.load %arg10[%c0_37, %c0_38] : memref<8x1xf32, #tpu.memory_space<vmem>>, vector<8x1xf32>
      tpu.vector_store %arg10[%c0_37, %c0_38], %47 {strides = array<i32>} : memref<8x1xf32, #tpu.memory_space<vmem>>, vector<8x1xf32>,
      %cst_39 = arith.constant 0.000000e+00 : f32
      %49 = vector.broadcast %cst_39 : f32 to vector<8x32xf32>
      %c0_40 = arith.constant 0 : index
      %c0_41 = arith.constant 0 : index
      %50 = vector.load %arg11[%c0_40, %c0_41] : memref<8x32xf32, #tpu.memory_space<vmem>>, vector<8x32xf32>
      tpu.vector_store %arg11[%c0_40, %c0_41], %49 {strides = array<i32>} : memref<8x32xf32, #tpu.memory_space<vmem>>, vector<8x32xf32>,
    } else {
    }
    %c0 = arith.constant 0 : index
    %c0_1 = arith.constant 0 : index
    %c0_2 = arith.constant 0 : index
    %3 = vector.load %arg3[%c0, %c0_1, %c0_2] : memref<1x8x32xf32, #tpu.memory_space<vmem>>, vector<1x8x32xf32>
    %4 = vector.shape_cast %3 : vector<1x8x32xf32> to vector<8x32xf32>
    %cst = arith.constant 0.176776692 : f32
    %5 = vector.broadcast %cst : f32 to vector<8x32xf32>
    %6 = arith.mulf %4, %5 : vector<8x32xf32>
    %c0_3 = arith.constant 0 : index
    %c0_4 = arith.constant 0 : index
    %c0_5 = arith.constant 0 : index
    %7 = vector.load %arg4[%c0_3, %c0_4, %c0_5] : memref<1x8x32xf32, #tpu.memory_space<vmem>>, vector<1x8x32xf32>
    %8 = vector.shape_cast %7 : vector<1x8x32xf32> to vector<8x32xf32>
    %c0_6 = arith.constant 0 : index
    %c0_7 = arith.constant 0 : index
    %c0_8 = arith.constant 0 : index
    %9 = vector.load %arg5[%c0_6, %c0_7, %c0_8] : memref<1x8x32xf32, #tpu.memory_space<vmem>>, vector<1x8x32xf32>
    %10 = vector.shape_cast %9 : vector<1x8x32xf32> to vector<8x32xf32>
    %cst_9 = arith.constant dense<0.000000e+00> : vector<8x8xf32>
    %11 = tpu.matmul %6, %8, %cst_9 {dimension_numbers = #tpu.dot_dimension_numbers<[1], [1], [0], [0], [0, 0, 1, 0], [], []>} : vector<8x32xf32>, vector<8x32xf32>, vector<8x8xf32> -> vector<8x8xf32>
    %c0_10 = arith.constant 0 : index
    %c0_11 = arith.constant 0 : index
    %c0_12 = arith.constant 0 : index
    %12 = vector.load %arg6[%c0_10, %c0_11, %c0_12] : memref<1x8x8xi32, #tpu.memory_space<vmem>>, vector<1x8x8xi32>
    %13 = vector.shape_cast %12 : vector<1x8x8xi32> to vector<8x8xi32>
    %cst_13 = arith.constant dense<0> : vector<8x8xi32>
    %14 = arith.cmpi ne, %13, %cst_13 : vector<8x8xi32>
    %15 = arith.extui %14 : vector<8x8xi1> to vector<8x8xi32>
    %c0_i32_14 = arith.constant 0 : i32
    %16 = vector.broadcast %c0_i32_14 : i32 to vector<8x8xi32>
    %17 = arith.cmpi ne, %15, %16 : vector<8x8xi32>
    %cst_15 = arith.constant -1.000000e+30 : f32
    %18 = vector.broadcast %cst_15 : f32 to vector<8x8xf32>
    %19 = arith.select %17, %18, %11 : vector<8x8xi1>, vector<8x8xf32>
    %c0_16 = arith.constant 0 : index
    %c0_17 = arith.constant 0 : index
    %20 = vector.load %arg9[%c0_16, %c0_17] : memref<8x1xf32, #tpu.memory_space<vmem>>, vector<8x1xf32>
    %cst_18 = arith.constant dense<0xFF800000> : vector<8xf32>
    %21 = vector.multi_reduction <maximumf>, %19, %cst_18 [1] : vector<8x8xf32> to vector<8xf32>
    %22 = vector.shape_cast %21 : vector<8xf32> to vector<8x1xf32>
    %23 = arith.maximumf %20, %22 : vector<8x1xf32>
    %24 = arith.subf %20, %23 : vector<8x1xf32>
    %25 = math.exp %24 : vector<8x1xf32>
    %26 = vector.broadcast %23 : vector<8x1xf32> to vector<8x8xf32>
    %27 = arith.subf %19, %26 : vector<8x8xf32>
    %28 = math.exp %27 : vector<8x8xf32>
    %c0_19 = arith.constant 0 : index
    %c0_20 = arith.constant 0 : index
    %29 = vector.load %arg10[%c0_19, %c0_20] : memref<8x1xf32, #tpu.memory_space<vmem>>, vector<8x1xf32>
    %30 = arith.mulf %25, %29 : vector<8x1xf32>
    %cst_21 = arith.constant dense<0.000000e+00> : vector<8xf32>
    %31 = vector.multi_reduction <add>, %28, %cst_21 [1] : vector<8x8xf32> to vector<8xf32>
    %32 = vector.shape_cast %31 : vector<8xf32> to vector<8x1xf32>
    %33 = arith.addf %30, %32 : vector<8x1xf32>
    %c0_22 = arith.constant 0 : index
    %c0_23 = arith.constant 0 : index
    %34 = vector.load %arg10[%c0_22, %c0_23] : memref<8x1xf32, #tpu.memory_space<vmem>>, vector<8x1xf32>
    tpu.vector_store %arg10[%c0_22, %c0_23], %33 {strides = array<i32>} : memref<8x1xf32, #tpu.memory_space<vmem>>, vector<8x1xf32>,
    %c0_24 = arith.constant 0 : index
    %c0_25 = arith.constant 0 : index
    %35 = vector.load %arg11[%c0_24, %c0_25] : memref<8x32xf32, #tpu.memory_space<vmem>>, vector<8x32xf32>
    %36 = vector.broadcast %25 : vector<8x1xf32> to vector<8x32xf32>
    %37 = arith.mulf %36, %35 : vector<8x32xf32>
    %cst_26 = arith.constant dense<0.000000e+00> : vector<8x32xf32>
    %38 = tpu.matmul %28, %10, %cst_26 {dimension_numbers = #tpu.dot_dimension_numbers<[1], [0], [0], [1], [0, 0, 1, 1], [], []>} : vector<8x8xf32>, vector<8x32xf32>, vector<8x32xf32> -> vector<8x32xf32>
    %39 = arith.addf %37, %38 : vector<8x32xf32>
    %c0_27 = arith.constant 0 : index
    %c0_28 = arith.constant 0 : index
    %40 = vector.load %arg11[%c0_27, %c0_28] : memref<8x32xf32, #tpu.memory_space<vmem>>, vector<8x32xf32>
    tpu.vector_store %arg11[%c0_27, %c0_28], %39 {strides = array<i32>} : memref<8x32xf32, #tpu.memory_space<vmem>>, vector<8x32xf32>,
    %c0_29 = arith.constant 0 : index
    %c0_30 = arith.constant 0 : index
    %41 = vector.load %arg9[%c0_29, %c0_30] : memref<8x1xf32, #tpu.memory_space<vmem>>, vector<8x1xf32>
    tpu.vector_store %arg9[%c0_29, %c0_30], %23 {strides = array<i32>} : memref<8x1xf32, #tpu.memory_space<vmem>>, vector<8x1xf32>,
    %c0_i32_31 = arith.constant 0 : i32
    %42 = arith.cmpi eq, %arg2, %c0_i32_31 : i32
    %43 = arith.extui %42 : i1 to i32
    %c0_i32_32 = arith.constant 0 : i32
    %44 = arith.cmpi ne, %43, %c0_i32_32 : i32
    scf.if %44 {
      %c0_33 = arith.constant 0 : index
      %c0_34 = arith.constant 0 : index
      %45 = vector.load %arg10[%c0_33, %c0_34] : memref<8x1xf32, #tpu.memory_space<vmem>>, vector<8x1xf32>
      %46 = tpu.reciprocal %45 {approx = true} : vector<8x1xf32> -> vector<8x1xf32>
      %47 = vector.broadcast %46 : vector<8x1xf32> to vector<8x8xf32>
      %48 = arith.mulf %28, %47 : vector<8x8xf32>
      %c0_35 = arith.constant 0 : index
      %c0_36 = arith.constant 0 : index
      %c0_37 = arith.constant 0 : index
      %49 = vector.load %arg8[%c0_35, %c0_36, %c0_37] : memref<1x8x8xf32, #tpu.memory_space<vmem>>, vector<1x8x8xf32>
      %50 = vector.shape_cast %49 : vector<1x8x8xf32> to vector<8x8xf32>
      %51 = vector.shape_cast %48 : vector<8x8xf32> to vector<1x8x8xf32>
      tpu.vector_store %arg8[%c0_35, %c0_36, %c0_37], %51 {strides = array<i32>} : memref<1x8x8xf32, #tpu.memory_space<vmem>>, vector<1x8x8xf32>,
      %c0_38 = arith.constant 0 : index
      %c0_39 = arith.constant 0 : index
      %52 = vector.load %arg11[%c0_38, %c0_39] : memref<8x32xf32, #tpu.memory_space<vmem>>, vector<8x32xf32>
      %53 = vector.broadcast %46 : vector<8x1xf32> to vector<8x32xf32>
      %54 = arith.mulf %52, %53 : vector<8x32xf32>
      %c0_40 = arith.constant 0 : index
      %c0_41 = arith.constant 0 : index
      %c0_42 = arith.constant 0 : index
      %55 = vector.load %arg7[%c0_40, %c0_41, %c0_42] : memref<1x8x32xf32, #tpu.memory_space<vmem>>, vector<1x8x32xf32>
      %56 = vector.shape_cast %55 : vector<1x8x32xf32> to vector<8x32xf32>
      %57 = vector.shape_cast %54 : vector<8x32xf32> to vector<1x8x32xf32>
      tpu.vector_store %arg7[%c0_40, %c0_41, %c0_42], %57 {strides = array<i32>} : memref<1x8x32xf32, #tpu.memory_space<vmem>>, vector<1x8x32xf32>,
    } else {
    }
    return
  }
  func.func @transform_0(%arg0: i32, %arg1: i32, %arg2: i32) -> (i32, i32, i32) {
    %c0_i32 = arith.constant 0 : i32
    %c0_i32_0 = arith.constant 0 : i32
    return %arg0, %arg1, %c0_i32 : i32, i32, i32
  }
  func.func @transform_1(%arg0: i32, %arg1: i32, %arg2: i32) -> (i32, i32, i32) {
    %c0_i32 = arith.constant 0 : i32
    %c0_i32_0 = arith.constant 0 : i32
    %c0_i32_1 = arith.constant 0 : i32
    return %arg0, %c0_i32, %c0_i32_0 : i32, i32, i32
  }
  func.func @transform_2(%arg0: i32, %arg1: i32, %arg2: i32) -> (i32, i32, i32) {
    %c0_i32 = arith.constant 0 : i32
    %c0_i32_0 = arith.constant 0 : i32
    %c0_i32_1 = arith.constant 0 : i32
    return %arg0, %c0_i32, %c0_i32_0 : i32, i32, i32
  }
  func.func @transform_3(%arg0: i32, %arg1: i32, %arg2: i32) -> (i32, i32, i32) {
    %c0_i32 = arith.constant 0 : i32
    return %arg0, %arg1, %arg2 : i32, i32, i32
  }
  func.func @transform_4(%arg0: i32, %arg1: i32, %arg2: i32) -> (i32, i32, i32) {
    %c0_i32 = arith.constant 0 : i32
    %c0_i32_0 = arith.constant 0 : i32
    return %arg0, %arg1, %c0_i32 : i32, i32, i32
  }
  func.func @transform_5(%arg0: i32, %arg1: i32, %arg2: i32) -> (i32, i32, i32) {
    %c0_i32 = arith.constant 0 : i32
    %c0_i32_0 = arith.constant 0 : i32
    return %arg0, %arg1, %c0_i32 : i32, i32, i32
  }
}

</mosaic_0001>

<bundles_post_ra>
// kernel: tpu_custom_call.1
= control target key start
LH: loop header
LB: loop body
LE: loop exit
PB: predicated region body
PF: predicated region fallthrough
CT: control target
= control target key end

     0   :  { %11 = vsyncpa [#allocation7], 0  ;;  %s1417_s0 = inlined_call_operand.vmem [shape: f32[2,8,32], index: 0, kind: input, shape index: {}]   ;;  %s1418_s1 = inlined_call_operand.hbm [shape: f32[2,8,32], index: 1, kind: input, shape index: {}]   ;;  %s1419_s2 = inlined_call_operand.hbm [shape: f32[2,8,32], index: 2, kind: input, shape index: {}]   ;;  %s1420_s3 = inlined_call_operand.vmem [shape: s32[2,8,8], index: 3, kind: input, shape index: {}]   ;;  %s1421_s4 = inlined_call_operand.hbm [shape: f32[2,8,32], index: 4, kind: output, shape index: {0}]   ;;  %s1422_s5 = inlined_call_operand.hbm [shape: f32[2,8,8], index: 5, kind: output, shape index: {1}]  }
   0x1   :  { %13 = vsyncpa [#allocation7 + $0x1], 0 }
   0x2   :  { %14 = vsyncpa [#allocation10], 0 }
   0x3   :  { %16 = vsyncpa [#allocation10 + $0x1], 0 }
   0x4   :  { %17 = vsyncpa [#allocation8], 0 }
   0x5   :  { %19 = vsyncpa [#allocation8 + $0x1], 0 }
   0x6   :  { %20 = vsyncpa [#allocation13], 0 }
   0x7   :  { %22 = vsyncpa [#allocation13 + $0x1], 0  ;;  %s1139_s18 = smov 0   ;;  %s1141_s19 = smov 0  }
   0x8   :  { %s1143_s20 = smov 0   ;;  %s1145_s21 = smov 0  }
   0x9   :  { %s1147_s22 = smov 0   ;;  %s1149_s23 = smov 0  }
   0xa LB: > { %s799_s24 = sadd.s32 4294967295, %s1099_s23   ;;  %s800_s25 = sadd.s32 4294967294, %s1099_s23   ;;  %s1099_s23 = sphi %s1149_s23, %s28_s23   ;;  %s1095_s22 = sphi %s1147_s22, %s1442_s22   ;;  %s1091_s21 = sphi %s1145_s21, %s1441_s21   ;;  %s1087_s20 = sphi %s1143_s20, %s1440_s20   ;;  %s1083_s19 = sphi %s1141_s19, %s1439_s19   ;;  %s1079_s18 = sphi %s1139_s18, %s1438_s18  }
   0xb   : > { %s47_s26 = sadd.s32 1, %s1095_s22  ;;  %s82_s27 = sadd.s32 1, %s1087_s20 }
   0xc   : > { %p49_p0 = scmp.ge.s32.totalorder %s47_s26, 2  ;;  %p89_p1 = scmp.ne.s32.totalorder %s1087_s20, %s1083_s19 }
   0xd   : > { %p90_p2 = scmp.eq.s32.totalorder %s1099_s23, 0  ;;  %p95_p3 = scmp.ne.s32.totalorder %s1083_s19, %s1079_s18 }
   0xe   : > { %s1444_s26 = smov (%p49_p0, %s47_s26), 0  ;;  %p96_p5 = scmp.eq.s32.totalorder %s799_s24, 0 }
   0xf   : > { %p1180_p4 = por %p90_p2, %p89_p1  ;;  %s79_s29 = ssub.s32 %s1095_s22, %s1444_s26 }
  0x10   : > { %p177_p6 = scmp.eq.s32.totalorder %s799_s24, 1  ;;  %p80_p7 = scmp.eq.s32.totalorder %s79_s29, 0 }
  0x11   : > { %p1186_p8 = por %p96_p5, %p95_p3  ;;  %p183_p10 = scmp.eq.s32.totalorder %s800_s25, 1 }
  0x12   : > { %p1190_p9 = por %p177_p6, %p89_p1  ;;  %p859_p13 = scmp.lt.s32.totalorder %s1099_s23, 2 }
  0x13   : > { %s1426_s30 = scalar_select %p1186_p8, 1, 0 }
  0x14   : > { %s1427_s6 = scalar_select %p1190_p9, 1, 0 }
  0x15   : > { %s1195_s7 = scalar_select %p80_p7, %s1087_s20, %s82_s27  }
  0x16   : > { %p1197_p11 = por %p183_p10, %p95_p3  ;;  %s1204_s9 = sand.u32 1, %s1087_s20  }
  0x17   : > { %s803_s10 = sshll.u32 %s1204_s9, 3  ;;  %s804_s11 = sshll.u32 %s1095_s22, 7 }
  0x18   : > { %s1428_s8 = scalar_select %p1197_p11, 1, 0 }
  0x19   : > { %s1213_s14 = scalar_lea.hbm %s1418_s1, %s804_s11  ;;  %s245_s15 = scalar_lea.vmem [#allocation6], %s803_s10 }
  0x1a   : > { %s252_s16 = sshll.u32 %s245_s15, 4  ;;  %p1221_p0 = pnand %p859_p13, %p1180_p4  ;;  %s1217_s16 = int_to_ptr.vmem [resolvable:$true] %s252_s16 }
  0x1b   : > { %s242_s24 = scalar_lea.sflag [#allocation7], %s1204_s9  ;;  %s921_s25 = scalar_lea.hbm %s1213_s14, 128 }
  0x1c   : > { %p922_p3 = scmp.ne.s32.totalorder %s1213_s14, %s921_s25  ;;  %p923_p5 = pneg %p1221_p0 }
  0x1d   : > { %s926_s28 = scalar_lea.hbm %s1418_s1, 256  ;;  %p927_p4 = scmp.lt.u32.totalorder %s1213_s14, %s1418_s1 }
  0x1e   : > { %p924_p6 = pnand %p923_p5, %p922_p3  ;;  %p928_p10 = scmp.lt.u32.totalorder %s926_s28, %s921_s25 }
  0x1f   : > { %p930_p12 = scmp.lt.u32.totalorder %s921_s25, %s1213_s14 }
  0x20   : > { %p925_p7 = pneg %p924_p6  ;;  %p929_p13 = por %p928_p10, %p927_p4 }
  0x22   : > { %p931_p1 = por %p930_p12, %p929_p13 }
  0x24   : > { %p932_p2 = pnand %p931_p1, %p925_p7 }
  0x26   : > { %935 = shalt.err (!%p932_p2)
}
  0x27   : > { %s936_s15 = scalar_lea.vmem %s1217_s16, 128  ;;  %s1101_s27 = smov [#allocation6]  }
  0x28   : > { %p937_p3 = scmp.ne.s32.totalorder %s1217_s16, %s936_s15  ;;  %s941_s29 = sshll.u32 %s1101_s27, 4  ;;  %s942_s29 = int_to_ptr.vmem [resolvable:$false] %s941_s29 }
  0x29   : > { %s943_s12 = scalar_lea.vmem %s942_s29, 256  ;;  %p944_p9 = scmp.lt.s32.totalorder %s1217_s16, %s942_s29 }
  0x2a   : > { %p939_p6 = pnand %p937_p3, %p923_p5  ;;  %p945_p4 = scmp.lt.s32.totalorder %s943_s12, %s936_s15 }
  0x2c   : > { %p940_p11 = pneg %p939_p6  ;;  %p946_p10 = por %p945_p4, %p944_p9 }
  0x2e   : > { %p947_p12 = pnand %p946_p10, %p940_p11 }
  0x30   : > { %950 = shalt.err (!%p947_p12)
}
  0x31   : > { %848 = dma.hbm_to_vmem [thread:$0]  (!%p1221_p0), %s1213_s14, 128, %s1217_s16, %s242_s24  }
  0x32   : > { %p1430_p1 = scmp.lt.s32.totalorder %s1099_s23, 3  ;;  %p1431_p2 = scmp.ge.s32.totalorder %s1099_s23, 1 }
  0x33   : > { %s1266_s15 = scalar_lea.hbm %s1419_s2, %s804_s11  ;;  %s263_s27 = scalar_lea.vmem [#allocation9], %s803_s10 }
  0x34   : > { %p1257_p7 = pnand %p1431_p2, %p1430_p1  ;;  %s270_s29 = sshll.u32 %s263_s27, 4  ;;  %s271_s29 = int_to_ptr.vmem [resolvable:$true] %s270_s29 }
  0x35   : > { %s260_s14 = scalar_lea.sflag [#allocation10], %s1204_s9  ;;  %s951_s16 = scalar_lea.hbm %s1266_s15, 128 }
  0x36   : > { %s1432_s25 = scalar_select %p1257_p7, 1, 0 }
  0x37   : > { %p952_p9 = scmp.ne.s32.totalorder %s1266_s15, %s951_s16  ;;  %s956_s11 = scalar_lea.hbm %s1419_s2, 256 }
  0x38   : > { %p957_p3 = scmp.lt.u32.totalorder %s1266_s15, %s1419_s2  ;;  %p958_p6 = scmp.lt.u32.totalorder %s956_s11, %s951_s16 }
  0x39   : > { %p954_p11 = pnand %p952_p9, %p923_p5  ;;  %p960_p10 = scmp.lt.u32.totalorder %s951_s16, %s1266_s15 }
  0x3a   : > { %p959_p4 = por %p958_p6, %p957_p3 }
  0x3b   : > { %p955_p13 = pneg %p954_p11 }
  0x3c   : > { %p961_p12 = por %p960_p10, %p959_p4 }
  0x3e   : > { %p962_p1 = pnand %p961_p12, %p955_p13 }
  0x40   : > { %965 = shalt.err (!%p962_p1)
}
  0x41   : > { %s966_s9 = scalar_lea.vmem %s271_s29, 128  ;;  %s1102_s10 = smov [#allocation9]  }
  0x42   : > { %p967_p2 = scmp.ne.s32.totalorder %s271_s29, %s966_s9  ;;  %s971_s27 = sshll.u32 %s1102_s10, 4  ;;  %s972_s27 = int_to_ptr.vmem [resolvable:$false] %s971_s27 }
  0x43   : > { %s973_s24 = scalar_lea.vmem %s972_s27, 256  ;;  %p974_p8 = scmp.lt.s32.totalorder %s271_s29, %s972_s27 }
  0x44   : > { %p969_p9 = pnand %p967_p2, %p923_p5  ;;  %p975_p7 = scmp.lt.s32.totalorder %s973_s24, %s966_s9 }
  0x46   : > { %p970_p11 = pneg %p969_p9  ;;  %p976_p3 = por %p975_p7, %p974_p8 }
  0x48   : > { %p977_p6 = pnand %p976_p3, %p970_p11 }
  0x4a   : > { %980 = shalt.err (!%p977_p6)
}
  0x4b   : > { %851 = dma.hbm_to_vmem [thread:$0]  (!%p1221_p0), %s1266_s15, 128, %s271_s29, %s260_s14  }
  0x4c   : > { %p1433_p13 = scmp.ne.s32.totalorder %s1432_s25, 0 }
  0x4d   : > { %s1293_s16 = sand.u32 (!%p1433_p13), 1, %s1083_s19   ;;  %p1434_p8 = scmp.ne.s32.totalorder (!%p1433_p13), %s1426_s30, 0 }
  0x4e   : > { %292 = sbr.rel (%p1433_p13) target bundleno = 930 (0x3a2), region = 36  ;;  %s1296_s12 = sshll.u32 (!%p1433_p13), %s1293_s16, 3 }
  0x4f   : > { %s295_s11 = scalar_lea.sflag (!%p1433_p13), [#allocation7], %s1293_s16  ;;  %s298_s28 = scalar_lea.vmem (!%p1433_p13), [#allocation6], %s1296_s12 }
  0x55   : > { %1062 = dma.done.wait (%p1434_p8), %s295_s11, 128  }
  0x56   : > { %1064 = vsyncadd (%p1434_p8), %s295_s11, 4294967168  ;;  %s304_s17 = scalar_lea.sflag [#allocation10], %s1293_s16  ;;  %s307_s25 = scalar_lea.vmem [#allocation9], %s1296_s12 }
  0x57   : > { %1066 = dma.done.wait (%p1434_p8), %s304_s17, 128  }
  0x58   : > { %1068 = vsyncadd (%p1434_p8), %s304_s17, 4294967168  ;;  %vm385_vm0 = vcmask 261120   ;;  %p361_p0 = scmp.lt.s32.totalorder %s1091_s21, 1  ;;  %v1103_v0 = vmov 0.0   ;;  %vm1104_vm1 = vmmov 0   ;;  %v389_v1 = vld [vmem:[%s298_s28] sm:$0xff] }
  0x59   : > { %827 = vmatprep.subr.mxu0 %v1103_v0  ;;  %386 = vst.msk [vmem:[#allocation4] sm:$0xff] %vm385_vm0, %v1103_v0  ;;  %829 = vmatprep.mubr.msk.f32.mxu0 %vm1104_vm1, %v1103_v0  ;;  %vm382_vm2 = vcmask 7168   ;;  %v1105_v4 = vmov -1e+30   ;;  %vm472_vm4 = vcmask 64512   ;;  %v1106_v10 = vmov 0  }
  0x5a   : > { %s362_s15 = scalar_select %p361_p0, %s1091_s21, 1  ;;  %832 = vmatprep.subr.mxu1 %v1103_v0  ;;  %834 = vmatprep.mubr.msk.f32.mxu1 %vm1104_vm1, %v1103_v0  ;;  %383 = vst.msk [vmem:[#allocation2] sm:$0xff] %vm382_vm2, %v1105_v4  ;;  %384 = vst.msk [vmem:[#allocation3] sm:$0xff] %vm382_vm2, %v1103_v0  ;;  %v390_v15 = vld [vmem:[%s307_s25] sm:$0xff] }
  0x5b   : > { %828 = vmatpush3.xpose.msk.msra.mxu0 %vm385_vm0, %v389_v1  ;;  %913 = vset.pattern.permute.xlu0 %v1106_v10  ;;  %s819_s24 = sshll.u32 %s1091_s21, 7  ;;  %s353_s11 = scalar_lea.vmem [#allocation11], %s1296_s12 }
  0x5c   : > { %s812_s29 = sshll.u32 %s362_s15, 3  ;;  %914 = vset.pattern.permute.xlu1 %v1106_v10  ;;  %833 = vmatpush3.msra.mxu1 %v390_v15  ;;  %s614_s28 = sshll.u32 %s353_s11, 4  ;;  %s1339_s28 = int_to_ptr.vmem [resolvable:$true] %s614_s28 }
  0x5d   : > { %s367_s9 = scalar_lea.vmem %s1417_s0, %s812_s29  ;;  %s377_s27 = scalar_lea.vmem %s1420_s3, %s812_s29 }
  0x5e   : > { %v387_v2 = vld [vmem:[%s367_s9] sm:$0xff]  ;;  %s360_s17 = scalar_lea.vmem [#allocation12], %s1296_s12  ;;  %s1337_s14 = scalar_lea.hbm %s1421_s4, %s819_s24 }
  0x5f   : > { %v388_v3 = vmul.f32 0.17677669, %v387_v2  ;;  %v468_v5 = vld [vmem:[%s377_s27] sm:$0xff]  ;;  %s628_s25 = sshll.u32 %s360_s17, 4  ;;  %s1344_s21 = scalar_lea.hbm %s1422_s5, %s819_s24  ;;  %s1346_s25 = int_to_ptr.vmem [resolvable:$true] %s628_s25 }
  0x60   : > { %vm469_vm3 = vcmp.ne.s32.totalorder %v468_v5, 0  ;;  %v496_v29 = vld [vmem:[#allocation4] sm:$0xff]  ;;  %s595_s12 = scalar_lea.sflag [#allocation8], %s1293_s16  ;;  %s981_s30 = scalar_lea.vmem %s1339_s28, 128 }
  0x61   : > { %830 = vmatmul.mubr.msk.f32.vlgmr.msra.gmra.mrb[0].mxu0 %vm385_vm0, %v388_v3  ;;  %v471_v11 = vld [vmem:[#allocation2] sm:$0xff]  ;;  %v488_v23 = vld [vmem:[#allocation3] sm:$0xff]  ;;  %p982_p5 = scmp.ne.s32.totalorder %s1339_s28, %s981_s30  ;;  %p1435_p7 = scmp.ne.s32.totalorder %s1427_s6, 0 }
  0x62   : > { %s1107_s10 = smov [#allocation11]  }
  0x63   : > { %p983_p4 = pnand %p982_p5, %p1435_p7  ;;  %s985_s27 = sshll.u32 %s1107_s10, 4  ;;  %s986_s27 = int_to_ptr.vmem [resolvable:$false] %s985_s27 }
  0x64   : > { %s987_s15 = scalar_lea.vmem %s986_s27, 256  ;;  %p988_p12 = scmp.lt.s32.totalorder %s1339_s28, %s986_s27 }
  0x65   : > { %p984_p10 = pneg %p983_p4  ;;  %p989_p1 = scmp.lt.s32.totalorder %s987_s15, %s981_s30 }
  0x67   : > { %p990_p2 = por %p989_p1, %p988_p12 }
  0x69   : > { %p991_p9 = pnand %p990_p2, %p984_p10 }
 0x134   : > { %v464_v6 = vpop.f32.mrb[0].mxu0 }
 0x135   : > { %v470_v7 = vsel %vm469_vm3, -1e+30, %v464_v6  ;;  %v831_v8 = vpop.f32.mrb[1].mxu0 }
 0x136   : > { %v473_v9 = vsel %vm472_vm4, %v470_v7, -inf }
 0x137   : > { %474 = vmax.xlane.f32.xlu0 %v473_v9 }
 0x1c4   : > { %v475_v12 = vpop.xlane.xlu0 %474 }
 0x1c5   : > { %v476_v13 = vmax.f32 %v471_v11, %v475_v12 }
 0x1c7   : > { %v477_v14 = vsub.f32 %v471_v11, %v476_v13  ;;  %578 = vst.msk [vmem:[#allocation2] sm:$0xff] %vm382_vm2, %v476_v13  ;;  %482 = vperm.xlu0 %913, %v476_v13  }
 0x1c9   : > { %v478_v21 = vmul.f32 1.442695, %v477_v14 }
 0x246   : > { %v483_v16 = vpop.permute.xlu0 %482 }
 0x247   : > { %v485_v17 = vsub.f32 %v470_v7, %v483_v16 }
 0x249   : > { %v486_v18 = vmul.f32 1.442695, %v485_v17 }
 0x24b   : > { %915 = vpow2.f32 %v486_v18 }
 0x24c   : > { %917 = vpow2.f32 %v478_v21 }
 0x255   : > { %v916_v19 = vpop.eup %915 }
 0x256   : > { %835 = vmatmul.mubr.msk.f32.vlgmr.msra.gmra.mrb[0].mxu1 %vm472_vm4, %v916_v19  ;;  %v490_v20 = vsel %vm472_vm4, %v916_v19, 0.0  ;;  %v918_v22 = vpop.eup %917 }
 0x257   : > { %491 = vadd.xlane.f32.xlu1 %v490_v20  ;;  %v489_v24 = vmul.f32 %v918_v22, %v488_v23 }
 0x268   : > { %499 = vperm.xlu1 %914, %v918_v22  }
 0x2e4   : > { %v492_v25 = vpop.xlane.xlu1 %491 }
 0x2e5   : > { %v493_v26 = vadd.f32 %v492_v25, %v489_v24 }
 0x2e7   : > { %495 = vst.msk [vmem:[#allocation3] sm:$0xff] %vm382_vm2, %v493_v26 }
 0x2e8   : > { %v500_v30 = vpop.permute.xlu1 %499 }
 0x2e9   : > { %v502_v31 = vmul.f32 %v500_v30, %v496_v29 }
 0x2ee   : > { %v582_v27 = vld [vmem:[#allocation3] sm:$0xff] }
 0x2ef   : > { %919 = vrcp.f32 %v582_v27 }
 0x2f9   : > { %v920_v28 = vpop.eup %919 }
 0x2fa   : > { %586 = vperm.xlu1 %914, %v920_v28  }
 0x329   : > { %v572_v32 = vpop.f32.mrb[0].mxu1 }
 0x32a   : > { %v576_v33 = vadd.f32 %v572_v32, %v502_v31  ;;  %v836_v34 = vpop.f32.mrb[1].mxu1 }
 0x32c   : > { %577 = vst.msk [vmem:[#allocation4] sm:$0xff] %vm385_vm0, %v576_v33 }
 0x333   : > { %v591_v35 = vld [vmem:[#allocation4] sm:$0xff] }
 0x379   : > { %v587_v36 = vpop.permute.xlu1 %586 }
 0x37a   : > { %v589_v37 = vmul.f32 %v916_v19, %v587_v36  ;;  %v592_v38 = vmul.f32 %v591_v35, %v587_v36 }
 0x37c   : > { %593 = vst.msk [vmem:[%s353_s11] sm:$0xff] %vm385_vm0, %v592_v38 }
 0x37d   : > { %590 = vst.msk [vmem:[%s360_s17] sm:$0xff] %vm472_vm4, %v589_v37 }
 0x37e   : > { %994 = shalt.err (!%p991_p9)
}
 0x37f   : > { %s995_s24 = scalar_lea.hbm %s1337_s14, 128  ;;  %s999_s29 = scalar_lea.hbm %s1421_s4, 256 }
 0x380   : > { %p996_p11 = scmp.ne.s32.totalorder %s1337_s14, %s995_s24  ;;  %p1000_p13 = scmp.lt.u32.totalorder %s1337_s14, %s1421_s4 }
 0x381   : > { %p1001_p8 = scmp.lt.u32.totalorder %s999_s29, %s995_s24  ;;  %p1003_p5 = scmp.lt.u32.totalorder %s995_s24, %s1337_s14 }
 0x382   : > { %p997_p3 = pnand %p996_p11, %p1435_p7 }
 0x383   : > { %p1002_p0 = por %p1001_p8, %p1000_p13 }
 0x384   : > { %p998_p6 = pneg %p997_p3 }
 0x385   : > { %p1004_p4 = por %p1003_p5, %p1002_p0 }
 0x387   : > { %p1005_p10 = pnand %p1004_p4, %p998_p6 }
 0x389   : > { %1008 = shalt.err (!%p1005_p10)
}
 0x38a   : > { %841 = dma.vmem_to_hbm [thread:$0]  (%p1435_p7), %s1339_s28, 128, %s1337_s14, %s595_s12  }
 0x38b   : > { %s600_s30 = scalar_lea.sflag [#allocation13], %s1293_s16  ;;  %s1009_s10 = scalar_lea.vmem %s1346_s25, 128 }
 0x38c   : > { %p1010_p12 = scmp.ne.s32.totalorder %s1346_s25, %s1009_s10  ;;  %s1108_s27 = smov [#allocation12]  }
 0x38d   : > { %s1013_s15 = sshll.u32 %s1108_s27, 4  ;;  %s1014_s15 = int_to_ptr.vmem [resolvable:$false] %s1013_s15 }
 0x38e   : > { %p1011_p1 = pnand %p1010_p12, %p1435_p7  ;;  %s1015_s24 = scalar_lea.vmem %s1014_s15, 256 }
 0x38f   : > { %p1016_p9 = scmp.lt.s32.totalorder %s1346_s25, %s1014_s15  ;;  %p1017_p11 = scmp.lt.s32.totalorder %s1015_s24, %s1009_s10 }
 0x390   : > { %p1012_p2 = pneg %p1011_p1 }
 0x391   : > { %p1018_p3 = por %p1017_p11, %p1016_p9 }
 0x393   : > { %p1019_p6 = pnand %p1018_p3, %p1012_p2 }
 0x395   : > { %1022 = shalt.err (!%p1019_p6)
}
 0x396   : > { %s1023_s16 = scalar_lea.hbm %s1344_s21, 128  ;;  %s1027_s12 = scalar_lea.hbm %s1422_s5, 256 }
 0x397   : > { %p1024_p13 = scmp.ne.s32.totalorder %s1344_s21, %s1023_s16  ;;  %p1028_p5 = scmp.lt.u32.totalorder %s1344_s21, %s1422_s5 }
 0x398   : > { %p1029_p4 = scmp.lt.u32.totalorder %s1027_s12, %s1023_s16  ;;  %p1031_p12 = scmp.lt.u32.totalorder %s1023_s16, %s1344_s21 }
 0x399   : > { %p1025_p8 = pnand %p1024_p13, %p1435_p7 }
 0x39a   : > { %p1030_p10 = por %p1029_p4, %p1028_p5 }
 0x39b   : > { %p1026_p0 = pneg %p1025_p8 }
 0x39c   : > { %p1032_p1 = por %p1031_p12, %p1030_p10 }
 0x39e   : > { %p1033_p2 = pnand %p1032_p1, %p1026_p0 }
 0x3a0   : > { %1036 = shalt.err (!%p1033_p2)
}
 0x3a1   : > { %842 = dma.vmem_to_hbm [thread:$0]  (%p1435_p7), %s1346_s25, 128, %s1344_s21, %s600_s30  }
 0x3a2 PF: > { %s640_s29 = sand.u32 1, %s1079_s18   ;;  %p1436_p9 = scmp.ne.s32.totalorder %s1428_s8, 0 }
 0x3a3   : > { %p1437_p11 = scmp.ge.s32.totalorder %s1099_s23, 2  ;;  %s641_s13 = scalar_lea.sflag [#allocation8], %s640_s29 }
 0x3a5   : > { %p853_p3 = pnand %p1437_p11, %p1436_p9 }
 0x3a7   : > { %1070 = dma.done.wait (!%p853_p3), %s641_s13, 128  }
 0x3a8   : > { %1072 = vsyncadd (!%p853_p3), %s641_s13, 4294967168  ;;  %s650_s9 = scalar_lea.sflag [#allocation13], %s640_s29 }
 0x3a9   : > { %1074 = dma.done.wait (!%p853_p3), %s650_s9, 128  }
 0x3aa   : > { %1076 = vsyncadd (!%p853_p3), %s650_s9, 4294967168  ;;  %s28_s23 = sadd.s32 1, %s1099_s23   ;;  %s1438_s18 = smov %s1083_s19 }
 0x3ab   : > { %p25_p6 = scmp.ge.s32.totalorder %s28_s23, 4   ;;  %s1439_s19 = smov %s1087_s20 }
 0x3ac   : > { %s1440_s20 = smov %s1195_s7  ;;  %s1441_s21 = smov %s1095_s22 }
 0x3ad   : > { %s1442_s22 = smov %s1444_s26  ;;  %27 = sbr.rel (!%p25_p6) target bundleno = 10 (0xa), region = 125 }
 0x3b4   :  { %655 = vsyncpa [#allocation7], 1 }
 0x3b5   :  { %657 = vsyncpa [#allocation7 + $0x1], 1 }
 0x3b6   :  { %658 = vsyncpa [#allocation10], 1 }
 0x3b7   :  { %660 = vsyncpa [#allocation10 + $0x1], 1 }
 0x3b8   :  { %661 = vsyncpa [#allocation8], 1 }
 0x3b9   :  { %663 = vsyncpa [#allocation8 + $0x1], 1 }
 0x3ba   :  { %664 = vsyncpa [#allocation13], 1 }
 0x3bb   :  { %666 = vsyncpa [#allocation13 + $0x1], 1 }

</bundles_post_ra>
